<compile_context>
chip_gen: v7x
topology: tpu7x:2x2x1
jax: 0.10.0
libtpu: 0.0.40
codegen_flags: <defaults>
</compile_context>

<pallas_src>
import functools

import jax
import jax.numpy as jnp
from jax.experimental import pallas as pl
from jax.experimental.pallas import tpu as pltpu

LEAKY_SLOPE = 0.01                      # nn.LeakyReLU default negative_slope
VMEM_LIMIT_BYTES = 48 * 1024 * 1024     # explicit scoped-VMEM budget (headroom on v7x 64 MiB)


def _cparams(dims):
    return pltpu.CompilerParams(dimension_semantics=dims,
                                vmem_limit_bytes=VMEM_LIMIT_BYTES)


def _pick_tile(n, pref, align):
    """Largest tile <= pref that divides n and keeps (8,128) alignment, else full extent."""
    if n <= pref:
        return n
    t = pref
    while t >= align:
        if n % t == 0:
            return t
        t //= 2
    return n  # full extent is always a legal block shape


# ---------------------------------------------------------------------------
# Kernel 1: row-tiled linear   out = X @ W    (D x D weight resident)
# ---------------------------------------------------------------------------
def _linear_kernel(x_ref, w_ref, o_ref):
    o_ref[...] = jnp.dot(x_ref[...], w_ref[...].astype(x_ref.dtype),
                         preferred_element_type=jnp.float32)


def linear(x, w, tile_m=256):
    n, din = x.shape
    dout = w.shape[1]
    tm = _pick_tile(n, tile_m, 8)
    return pl.pallas_call(
        _linear_kernel,
        out_shape=jax.ShapeDtypeStruct((n, dout), jnp.float32),
        grid=(n // tm,),
        in_specs=[pl.BlockSpec((tm, din), lambda i: (i, 0)),
                  pl.BlockSpec((din, dout), lambda i: (0, 0))],
        out_specs=pl.BlockSpec((tm, dout), lambda i: (i, 0)),
        compiler_params=_cparams(("parallel",)),
    )(x, w)


# ---------------------------------------------------------------------------
# Kernel 2: tiled dense propagation   out = act(M @ Y + bias)
#   grid = (row tiles, K-reduction tiles); f32 accumulator in VMEM scratch.
# ---------------------------------------------------------------------------
def _prop_kernel(m_ref, y_ref, b_ref, o_ref, acc_ref, *, activation):
    k = pl.program_id(1)

    @pl.when(k == 0)
    def _():
        acc_ref[...] = jnp.zeros_like(acc_ref)

    acc_ref[...] += jnp.dot(m_ref[...], y_ref[...].astype(m_ref.dtype),
                            preferred_element_type=jnp.float32)

    @pl.when(k == pl.num_programs(1) - 1)
    def _():
        h = acc_ref[...] + b_ref[...]
        if activation == "leaky_relu":
            h = jnp.where(h >= 0.0, h, LEAKY_SLOPE * h)
        o_ref[...] = h


def propagate(m, y, bias=None, activation="none", tile_m=256, tile_k=512):
    n = m.shape[0]
    d = y.shape[1]
    tm = _pick_tile(n, tile_m, 8)
    tk = _pick_tile(n, tile_k, 128)
    bias2d = (jnp.zeros((1, d), jnp.float32) if bias is None
              else bias.reshape(1, d).astype(jnp.float32))
    kernel = functools.partial(_prop_kernel, activation=activation)
    return pl.pallas_call(
        kernel,
        out_shape=jax.ShapeDtypeStruct((n, d), jnp.float32),
        grid=(n // tm, n // tk),
        in_specs=[pl.BlockSpec((tm, tk), lambda i, k: (i, k)),   # M tile
                  pl.BlockSpec((tk, d), lambda i, k: (k, 0)),    # Y tile
                  pl.BlockSpec((1, d), lambda i, k: (0, 0))],    # bias (resident)
        out_specs=pl.BlockSpec((tm, d), lambda i, k: (i, 0)),
        scratch_shapes=[pltpu.VMEM((tm, d), jnp.float32)],
        compiler_params=_cparams(("parallel", "arbitrary")),
    )(m, y, bias2d)


# ---------------------------------------------------------------------------
# Kernel 3: e_ij decode (2-D tiled)
#   e_ij = (dec @ in2^T) * (a * dist^b * exp(c * dist)),  dec = out2 @ W_dec (kernel 1)
# ---------------------------------------------------------------------------
def _eij_kernel(abc_ref, dec_ref, in2t_ref, dist_ref, o_ref):
    a = abc_ref[0]
    b = abc_ref[1]
    c = abc_ref[2]
    scores = jnp.dot(dec_ref[...], in2t_ref[...], preferred_element_type=jnp.float32)
    dist = dist_ref[...]
    # a * dist**b * exp(c*dist) fused into a single exp (matches torch pow for dist > 0;
    # dist <= 0 yields the same NaN/Inf behaviour as torch's pow).
    fx = a * jnp.exp(b * jnp.log(dist) + c * dist)
    o_ref[...] = scores * fx


def eij_decode(dec, in2, dist, abc, tile_m=256, tile_n=512):
    p, d = dec.shape
    tm = _pick_tile(p, tile_m, 8)
    tn = _pick_tile(p, tile_n, 128)
    return pl.pallas_call(
        _eij_kernel,
        out_shape=jax.ShapeDtypeStruct((p, p), jnp.float32),
        grid=(p // tm, p // tn),
        in_specs=[
            pl.BlockSpec(memory_space=pltpu.MemorySpace.SMEM),   # (a, b, c) scalars
            pl.BlockSpec((tm, d), lambda i, j: (i, 0)),          # decoded out2 row tile
            pl.BlockSpec((d, tn), lambda i, j: (0, j)),          # in2^T column tile
            pl.BlockSpec((tm, tn), lambda i, j: (i, j)),         # distance tile
        ],
        out_specs=pl.BlockSpec((tm, tn), lambda i, j: (i, j)),
        compiler_params=_cparams(("parallel", "parallel")),
    )(abc, dec, in2.T, dist)


# ---------------------------------------------------------------------------
# Kernel 4: user update layer (algebraically collapsed GCN row-sum)
#   s        = (v_poi @ out_k) @ Wg + (P+U)*bg        (v_poi = colsum(Nhat_big^T)[:P])
#   user_out = sigmoid(U @ Wu + s)
#   grid = (P reduction tiles,); (1, D) accumulator in VMEM scratch.
# ---------------------------------------------------------------------------
def _user_layer_kernel(vrow_ref, outk_ref, u_ref, wu_ref, wg_ref, bg_ref, o_ref, acc_ref):
    k = pl.program_id(0)

    @pl.when(k == 0)
    def _():
        acc_ref[...] = jnp.zeros_like(acc_ref)

    acc_ref[...] += jnp.dot(vrow_ref[...], outk_ref[...].astype(vrow_ref.dtype),
                            preferred_element_type=jnp.float32)

    @pl.when(k == pl.num_programs(0) - 1)
    def _():
        s = jnp.dot(acc_ref[...], wg_ref[...], preferred_element_type=jnp.float32) + bg_ref[...]
        lin = jnp.dot(u_ref[...], wu_ref[...], preferred_element_type=jnp.float32)
        o_ref[...] = jax.nn.sigmoid(lin + s)


def user_layer(u, wu, v_poi, out_k, wg, bg_scaled, tile_k=512):
    un, d = u.shape
    p = out_k.shape[0]
    tk = _pick_tile(p, tile_k, 128)
    return pl.pallas_call(
        _user_layer_kernel,
        out_shape=jax.ShapeDtypeStruct((un, d), jnp.float32),
        grid=(p // tk,),
        in_specs=[pl.BlockSpec((1, tk), lambda k: (0, k)),       # v_poi tile
                  pl.BlockSpec((tk, d), lambda k: (k, 0)),       # out_k tile
                  pl.BlockSpec((un, d), lambda k: (0, 0)),       # user embeddings (resident)
                  pl.BlockSpec((d, d), lambda k: (0, 0)),        # Wu
                  pl.BlockSpec((d, d), lambda k: (0, 0)),        # Wg
                  pl.BlockSpec((1, d), lambda k: (0, 0))],       # (P+U)*bg
        out_specs=pl.BlockSpec((un, d), lambda k: (0, 0)),
        scratch_shapes=[pltpu.VMEM((1, d), jnp.float32)],
        compiler_params=_cparams(("arbitrary",)),
    )(v_poi, out_k, u, wu, wg, bg_scaled.reshape(1, d))


# ---------------------------------------------------------------------------
# Glue: dense equivalent of torch_geometric GCNConv normalization (plain JAX setup)
# ---------------------------------------------------------------------------
def gcn_norm_dense_T(adj_bin):
    """Return Nhat^T for PyG GCNConv with unit edge weights + self loops."""
    n = adj_bin.shape[0]
    a_tilde = adj_bin + jnp.eye(n, dtype=jnp.float32)
    deg = jnp.sum(a_tilde, axis=0)                           # in-degree of target (col)
    dinv = jnp.where(deg > 0.0, 1.0 / jnp.sqrt(deg), 0.0)
    nhat = dinv[:, None] * a_tilde * dinv[None, :]
    return nhat.T


# ---------------------------------------------------------------------------
# Full GPR forward
# ---------------------------------------------------------------------------
def gpr_forward(params, poi_poi, dist, user_poi, user_ids, positives, negatives,
                compute_dtype=jnp.float32):
    """compute_dtype=jnp.bfloat16 halves HBM traffic / VMEM for the N x N operands and
    uses the fast MXU path (per perf review); float32 keeps exact reference parity."""
    P = poi_poi.shape[0]
    U = user_poi.shape[0]
    D = params["p_embed"].shape[1]

    # --- GGLR preprocessing (plain JAX, O(N^2) elementwise) ---
    a_bin = (poi_poi > 0.0).astype(jnp.float32)
    d_out = jnp.sum(a_bin, axis=-1) + 1e-7
    d_in = jnp.sum(a_bin.T, axis=-1) + 1e-7

    nhat_t_out = gcn_norm_dense_T(a_bin).astype(compute_dtype)     # edges from A.nonzero()
    nhat_t_in = gcn_norm_dense_T(a_bin.T).astype(compute_dtype)    # edges from A.T.nonzero()

    # fold the 1/D row scaling into A once; reused by both layers of each direction
    a_out_scaled = (poi_poi / d_out[:, None]).astype(compute_dtype)
    a_in_scaled = (poi_poi.T / d_in[:, None]).astype(compute_dtype)

    p1 = params["p_embed"]
    q1 = params["q_embed"]
    u1 = params["user_embed"]

    def gglr_layer(a_scaled, nhat_t, x, w, b):
        xw = linear(x, w)                                          # X @ W
        gcn = propagate(nhat_t, xw, bias=b)                        # Nhat^T @ XW + b
        return propagate(a_scaled, gcn, activation="leaky_relu")   # LReLU((A/d) @ gcn)

    out1 = gglr_layer(a_out_scaled, nhat_t_out, p1, params["w_out1"], params["b_out1"])
    out2 = gglr_layer(a_out_scaled, nhat_t_out, out1, params["w_out2"], params["b_out2"])
    in1 = gglr_layer(a_in_scaled, nhat_t_in, q1, params["w_in1"], params["b_in1"])
    in2 = gglr_layer(a_in_scaled, nhat_t_in, in1, params["w_in2"], params["b_in2"])

    dec = linear(out2, params["w_dec"])
    e_ij_hat = eij_decode(dec, in2, dist, params["abc"])

    # --- GPR user stack ---
    # sum_rows(Nhat_big^T @ (Xbig @ Wg) + bg) == (colsum(Nhat_big^T) @ Xbig) @ Wg + (P+U)*bg
    # with Xbig = [out_k ; 0]: only the POI part of the column-sum vector matters, and for
    # the bipartite user->POI graph (+ self loops) it is exactly dinv_poi^2 = 1/(1+in_deg).
    upb_bin = (user_poi > 0.0).astype(jnp.float32)
    deg_poi = 1.0 + jnp.sum(upb_bin, axis=0)                 # self loop + user edges into p
    dinv_poi = 1.0 / jnp.sqrt(deg_poi)
    v_poi = (dinv_poi * dinv_poi).reshape(1, P).astype(compute_dtype)
    n_big = float(P + U)

    user1 = user_layer(u1, params["w_user1"], v_poi, out1,
                       params["w_g1"], n_big * params["b_g1"])
    user2 = user_layer(user1, params["w_user2"], v_poi, out2,
                       params["w_g2"], n_big * params["b_g2"])

    result_u = jnp.concatenate([user1, user2], axis=-1)
    result_q = jnp.concatenate([in1, in2], axis=-1)

    tt = result_u[user_ids]
    pp = result_q[positives]
    qq = result_q[negatives]

    # BPR ratings diag(tt @ pp^T) / diag(tt @ qq^T): tiny, launch-overhead dominated as a
    # Pallas call (perf review) -> plain JAX, XLA fuses it with the gathers.
    rating_ul = jnp.sum(tt * pp, axis=-1)
    rating_ul_prime = jnp.sum(tt * qq, axis=-1)
    return rating_ul, rating_ul_prime, e_ij_hat


# ---------------------------------------------------------------------------
# Deterministic parameter construction + demo
# ---------------------------------------------------------------------------
def _xavier_normal(key, shape):
    fan_out, fan_in = shape
    std = (2.0 / (fan_in + fan_out)) ** 0.5
    return std * jax.random.normal(key, shape, jnp.float32)


def _glorot_uniform(key, shape):
    fan_in, fan_out = shape
    lim = (6.0 / (fan_in + fan_out)) ** 0.5
    return jax.random.uniform(key, shape, jnp.float32, -lim, lim)


if __name__ == "__main__":
    POI_NUM, USER_NUM, EMBED_DIM, BATCH = 16, 8, 32, 6

    key = jax.random.PRNGKey(0)
    ks = jax.random.split(key, 24)

    # graphs / distances (strictly positive distances so dist**b is well defined)
    mask = (jax.random.uniform(ks[0], (POI_NUM, POI_NUM)) < 0.3).astype(jnp.float32)
    poi_poi = mask * jax.random.uniform(ks[1], (POI_NUM, POI_NUM), minval=0.1, maxval=1.0)
    distance = jax.random.uniform(ks[2], (POI_NUM, POI_NUM), minval=0.5, maxval=5.0)
    user_poi = (jax.random.uniform(ks[3], (USER_NUM, POI_NUM)) < 0.3).astype(jnp.float32)

    params = {
        "abc": jax.random.uniform(ks[4], (3,), jnp.float32, -1.0, 1.0),
        "user_embed": _xavier_normal(ks[5], (USER_NUM, EMBED_DIM)),
        "p_embed": _xavier_normal(ks[6], (POI_NUM, EMBED_DIM)),
        "q_embed": _xavier_normal(ks[7], (POI_NUM, EMBED_DIM)),
        # GGLR GCNConv weights (bias zero-init, as in PyG)
        "w_out1": _glorot_uniform(ks[8], (EMBED_DIM, EMBED_DIM)),
        "b_out1": jnp.zeros((EMBED_DIM,), jnp.float32),
        "w_out2": _glorot_uniform(ks[9], (EMBED_DIM, EMBED_DIM)),
        "b_out2": jnp.zeros((EMBED_DIM,), jnp.float32),
        "w_in1": _glorot_uniform(ks[10], (EMBED_DIM, EMBED_DIM)),
        "b_in1": jnp.zeros((EMBED_DIM,), jnp.float32),
        "w_in2": _glorot_uniform(ks[11], (EMBED_DIM, EMBED_DIM)),
        "b_in2": jnp.zeros((EMBED_DIM,), jnp.float32),
        "w_dec": _glorot_uniform(ks[12], (EMBED_DIM, EMBED_DIM)),
        # GPR layers
        "w_user1": _glorot_uniform(ks[13], (EMBED_DIM, EMBED_DIM)),
        "w_user2": _glorot_uniform(ks[14], (EMBED_DIM, EMBED_DIM)),
        "w_g1": _glorot_uniform(ks[15], (EMBED_DIM, EMBED_DIM)),
        "b_g1": jnp.zeros((EMBED_DIM,), jnp.float32),
        "w_g2": _glorot_uniform(ks[16], (EMBED_DIM, EMBED_DIM)),
        "b_g2": jnp.zeros((EMBED_DIM,), jnp.float32),
    }

    user_ids = jax.random.randint(ks[17], (BATCH,), 0, USER_NUM)
    train_positives = jax.random.randint(ks[18], (BATCH,), 0, POI_NUM)
    train_negatives = jax.random.randint(ks[19], (BATCH,), 0, POI_NUM)

    fwd = functools.partial(gpr_forward, params, poi_poi, distance, user_poi)
    rating_ul, rating_ul_prime, e_ij_hat = fwd(user_ids, train_positives, train_negatives)
    jax.block_until_ready((rating_ul, rating_ul_prime, e_ij_hat))

    assert rating_ul.shape == (BATCH,)
    assert rating_ul_prime.shape == (BATCH,)
    assert e_ij_hat.shape == (POI_NUM, POI_NUM)
    print("KERNEL_OK")
</pallas_src>

<mosaic_0001>
module attributes {stable_mosaic.version = 11 : i64} {
  func.func @_linear_kernel(%arg0: i32, %arg1: memref<16x32xf32, #tpu.memory_space<vmem>>, %arg2: memref<32x32xf32, #tpu.memory_space<vmem>>, %arg3: memref<16x32xf32, #tpu.memory_space<vmem>>) attributes {dimension_semantics = [#tpu.dimension_semantics<parallel>], iteration_bounds = array<i64: 1>, scalar_prefetch = 0 : i64, scratch_operands = 0 : i64, tpu.core_type = #tpu.core_type<tc>, window_params = [{transform_indices = @transform_0, window_bounds = array<i64: 16, 32>}, {pipeline_mode = #tpu.pipeline_mode<synchronous>, transform_indices = @transform_1, window_bounds = array<i64: 32, 32>}, {transform_indices = @transform_2, window_bounds = array<i64: 16, 32>}]} {
    %c0 = arith.constant 0 : index
    %c0_0 = arith.constant 0 : index
    %0 = vector.load %arg1[%c0, %c0_0] : memref<16x32xf32, #tpu.memory_space<vmem>>, vector<16x32xf32>
    %c0_1 = arith.constant 0 : index
    %c0_2 = arith.constant 0 : index
    %1 = vector.load %arg2[%c0_1, %c0_2] : memref<32x32xf32, #tpu.memory_space<vmem>>, vector<32x32xf32>
    %cst = arith.constant dense<0.000000e+00> : vector<16x32xf32>
    %2 = tpu.matmul %0, %1, %cst {dimension_numbers = #tpu.dot_dimension_numbers<[1], [0], [0], [1], [0, 0, 1, 1], [], []>} : vector<16x32xf32>, vector<32x32xf32>, vector<16x32xf32> -> vector<16x32xf32>
    %c0_3 = arith.constant 0 : index
    %c0_4 = arith.constant 0 : index
    %3 = vector.load %arg3[%c0_3, %c0_4] : memref<16x32xf32, #tpu.memory_space<vmem>>, vector<16x32xf32>
    tpu.vector_store %arg3[%c0_3, %c0_4], %2 {strides = array<i32>} : memref<16x32xf32, #tpu.memory_space<vmem>>, vector<16x32xf32>,
    return
  }
  func.func @transform_0(%arg0: i32) -> (i32, i32) {
    %c0_i32 = arith.constant 0 : i32
    %c0_i32_0 = arith.constant 0 : i32
    return %arg0, %c0_i32 : i32, i32
  }
  func.func @transform_1(%arg0: i32) -> (i32, i32) {
    %c0_i32 = arith.constant 0 : i32
    %c0_i32_0 = arith.constant 0 : i32
    %c0_i32_1 = arith.constant 0 : i32
    return %c0_i32, %c0_i32_0 : i32, i32
  }
  func.func @transform_2(%arg0: i32) -> (i32, i32) {
    %c0_i32 = arith.constant 0 : i32
    %c0_i32_0 = arith.constant 0 : i32
    return %arg0, %c0_i32 : i32, i32
  }
}

</mosaic_0001>

<bundles_post_ra>
// kernel: tpu_custom_call.1
= control target key start
LH: loop header
LB: loop body
LE: loop exit
PB: predicated region body
PF: predicated region fallthrough
CT: control target
= control target key end

     0   :  { %7 = vsyncpa [#allocation3], 0  ;;  %s321_s0 = inlined_call_operand.hbm [shape: f32[16,32], index: 0, kind: input, shape index: {}]   ;;  %s322_s1 = inlined_call_operand.hbm [shape: f32[32,32], index: 1, kind: input, shape index: {}]   ;;  %s323_s2 = inlined_call_operand.hbm [shape: f32[16,32], index: 2, kind: output, shape index: {}]  }
   0x1   :  { %8 = vsyncpa [#allocation6], 0 }
   0x2   :  { %9 = vsyncpa [#allocation4], 0  ;;  %s252_s9 = smov [#allocation2]   ;;  %s180_s13 = scalar_lea.hbm %s321_s0, 256 }
   0x3   :  { %s15_s10 = sshll.u32 %s252_s9, 4  ;;  %p181_p0 = scmp.ne.s32.totalorder %s321_s0, %s180_s13  ;;  %s16_s10 = int_to_ptr.vmem [resolvable:$true] %s15_s10 }
   0x4   :  { %p184_p1 = scmp.lt.u32.totalorder %s180_s13, %s321_s0 }
   0x6   :  { %p186_p2 = pnand %p184_p1, %p181_p0 }
   0x8   :  { %189 = shalt.err (!%p186_p2)
}
   0x9   :  { %s190_s18 = scalar_lea.vmem %s16_s10, 256  ;;  %p195_p4 = scmp.lt.s32.totalorder %s16_s10, %s16_s10 }
   0xa   :  { %p191_p3 = scmp.ne.s32.totalorder %s16_s10, %s190_s18  ;;  %p196_p5 = scmp.lt.s32.totalorder %s190_s18, %s190_s18 }
   0xc   :  { %p197_p6 = por %p196_p5, %p195_p4 }
   0xe   :  { %p198_p7 = pnand %p197_p6, %p191_p3 }
  0x10   :  { %201 = shalt.err (!%p198_p7)
}
  0x11   :  { %s253_s19 = smov 128   ;;  %s254_s20 = smov 8  }
  0x12   :  { %21 = dma.hbm_to_vmem [thread:$0]  %s321_s0, 256, %s16_s10, [#allocation3], %s253_s19, %s253_s19, %s254_s20  }
  0x13   :  { %s255_s23 = smov [#allocation5]   ;;  %s202_s27 = scalar_lea.hbm %s322_s1, 512 }
  0x14   :  { %s27_s24 = sshll.u32 %s255_s23, 4  ;;  %p203_p8 = scmp.ne.s32.totalorder %s322_s1, %s202_s27  ;;  %s28_s24 = int_to_ptr.vmem [resolvable:$true] %s27_s24 }
  0x15   :  { %p206_p9 = scmp.lt.u32.totalorder %s202_s27, %s322_s1 }
  0x17   :  { %p208_p10 = pnand %p206_p9, %p203_p8 }
  0x19   :  { %211 = shalt.err (!%p208_p10)
}
  0x1a   :  { %s212_s4 = scalar_lea.vmem %s28_s24, 512  ;;  %p217_p12 = scmp.lt.s32.totalorder %s28_s24, %s28_s24 }
  0x1b   :  { %p213_p11 = scmp.ne.s32.totalorder %s28_s24, %s212_s4  ;;  %p218_p13 = scmp.lt.s32.totalorder %s212_s4, %s212_s4 }
  0x1d   :  { %p219_p0 = por %p218_p13, %p217_p12 }
  0x1f   :  { %p220_p1 = pnand %p219_p0, %p213_p11 }
  0x21   :  { %223 = shalt.err (!%p220_p1)
}
  0x22   :  { %33 = dma.hbm_to_vmem [thread:$0]  %s322_s1, 512, %s28_s24, [#allocation6], %s253_s19, %s253_s19, %s254_s20  }
  0x23   :  { %246 = dma.done.wait [#allocation3], 256  }
  0x24   :  { %247 = vsyncadd [#allocation3], 4294967040 }
  0x25   :  { %248 = dma.done.wait [#allocation6], 512  }
  0x26   :  { %249 = vsyncadd [#allocation6], 4294966784  ;;  %vm46_vm0 = vcmask 261120   ;;  %v42_v0 = vld [vmem:[#allocation5] sm:$0xff]  ;;  %v43_v1 = vld [vmem:[#allocation5 + $0x8] sm:$0xff]  ;;  %s256_s1 = smov [#allocation7]  }
  0x27   :  { %v44_v2 = vld [vmem:[#allocation5 + $0x10] sm:$0xff]  ;;  %v167_v3 = vpack.c.bf16 %v43_v1, %v42_v0  ;;  %v45_v4 = vld [vmem:[#allocation5 + $0x18] sm:$0xff]  ;;  %s135_s6 = sshll.u32 %s256_s1, 4  ;;  %s136_s6 = int_to_ptr.vmem [resolvable:$true] %s135_s6 }
  0x28   :  { %v40_v5 = vld [vmem:[#allocation2] sm:$0xff]  ;;  %v171_v6 = vpack.c.bf16 %v45_v4, %v44_v2  ;;  %v41_v7 = vld [vmem:[#allocation2 + $0x8] sm:$0xff]  ;;  %s224_s7 = scalar_lea.vmem %s136_s6, 256  ;;  %p229_p3 = scmp.lt.s32.totalorder %s136_s6, %s136_s6 }
  0x29   :  { %164 = vmatprep.mubr.msk.f32.mxu0 %vm46_vm0, %v40_v5  ;;  %168 = vmatprep.subr.bf16.mxu0 %v167_v3  ;;  %p225_p2 = scmp.ne.s32.totalorder %s136_s6, %s224_s7  ;;  %p230_p4 = scmp.lt.s32.totalorder %s224_s7, %s224_s7 }
  0x2a   :  { %170 = vmatpush3.bf16.msra.mxu0 %v167_v3 }
  0x2b   :  { %172 = vmatprep.subr.bf16.mxu0 %v171_v6  ;;  %p231_p5 = por %p230_p4, %p229_p3 }
  0x2d   :  { %p232_p6 = pnand %p231_p5, %p225_p2 }
  0x2e   :  { %174 = vmatpush3.bf16.msra.mxu0 %v171_v6 }
  0x31   :  { %165 = vmatmul.mubr.msk.f32.vlgmr.msra.gmra.mrb[0].mxu0 %vm46_vm0, %v41_v7 }
 0x104   :  { %v166_v8 = vpop.f32.mrb[0].mxu0 }
 0x105   :  { %129 = vst.msk [vmem:[#allocation7 + $0x8] sm:$0xff] %vm46_vm0, %v166_v8  ;;  %v119_v9 = vpop.f32.mrb[1].mxu0 }
 0x106   :  { %128 = vst.msk [vmem:[#allocation7] sm:$0xff] %vm46_vm0, %v119_v9 }
 0x107   :  { %235 = shalt.err (!%p232_p6)
}
 0x108   :  { %s236_s10 = scalar_lea.hbm %s323_s2, 256 }
 0x109   :  { %p237_p7 = scmp.ne.s32.totalorder %s323_s2, %s236_s10  ;;  %p240_p8 = scmp.lt.u32.totalorder %s236_s10, %s323_s2 }
 0x10b   :  { %p242_p9 = pnand %p240_p8, %p237_p7 }
 0x10d   :  { %245 = shalt.err (!%p242_p9)
}
 0x10e   :  { %141 = dma.vmem_to_hbm [thread:$0]  %s136_s6, 256, %s323_s2, [#allocation4], %s253_s19, %s253_s19, %s254_s20  }
 0x10f   :  { %250 = dma.done.wait [#allocation4], 256  }
 0x110   :  { %251 = vsyncadd [#allocation4], 4294967040 }
 0x111   :  { %145 = vsyncpa [#allocation3], 1 }
 0x112   :  { %146 = vsyncpa [#allocation6], 1 }
 0x113   :  { %147 = vsyncpa [#allocation4], 1 }

</bundles_post_ra>
